<compile_context>
chip_gen: v5e
topology: v5e:2x2
jax: 0.10.0
libtpu: 0.0.40
codegen_flags: <defaults>
</compile_context>

<pallas_src>
import functools

import jax
import jax.numpy as jnp
from jax.experimental import pallas as pl
from jax.experimental.pallas import tpu as pltpu


def _neck_kernel(x_ref, w_ref, bias_ref, o_ref, *, relu):
    # x_ref:    (1, C_in, HW)  one batch element, channels-first, spatial on lanes
    # w_ref:    (C_out, C_in)  conv weight with BN scale already folded in
    # bias_ref: (C_out, 1)     folded BN bias (broadcasts along the lane axis)
    # o_ref:    (1, C_out, HW)
    y = jnp.dot(w_ref[...], x_ref[0], preferred_element_type=jnp.float32)
    y = y + bias_ref[...]
    if relu:
        y = jnp.maximum(y, 0.0)
    o_ref[0] = y.astype(o_ref.dtype)


def man_neck_forward(x_nchw, conv_w, bn_gamma, bn_beta, bn_mean, bn_var,
                     *, relu=True, center_size=7, eps=1e-5):
    """Forward pass matching ManNeck.forward (BatchNorm in eval/inference mode).

    x_nchw : (B, C_in, H, W) float32
    conv_w : (C_out, C_in, 1, 1) float32  (nn.Conv2d weight, bias=False)
    bn_*   : (C_out,) float32
    returns: (B, C_out, H', W') float32 where H'=W'=center_size if W < 20.
    """
    B, C_in, H, W = x_nchw.shape
    C_out = conv_w.shape[0]

    # ---- crop FIRST (commutes with the pointwise conv/BN/ReLU) ----
    if W < 20:
        assert W >= center_size, "center crop requires W >= center_size"
        l = (W - center_size) // 2
        r = l + center_size
        x_nchw = x_nchw[:, :, l:r, l:r]
        H = W = center_size

    HW = H * W
    x = x_nchw.reshape(B, C_in, HW)                       # NCHW view, no transpose

    # ---- fold conv weight + BN into a single weight and bias ----
    scale = bn_gamma / jnp.sqrt(bn_var + eps)             # (C_out,)
    w_scaled = conv_w.reshape(C_out, C_in) * scale[:, None]   # (C_out, C_in)
    bias = (bn_beta - bn_mean * scale).reshape(C_out, 1)      # (C_out, 1)

    kernel = functools.partial(_neck_kernel, relu=relu)
    y = pl.pallas_call(
        kernel,
        out_shape=jax.ShapeDtypeStruct((B, C_out, HW), jnp.float32),
        grid_spec=pltpu.PrefetchScalarGridSpec(
            num_scalar_prefetch=0,
            grid=(B,),
            in_specs=[
                pl.BlockSpec((1, C_in, HW), lambda b: (b, 0, 0)),
                pl.BlockSpec((C_out, C_in), lambda b: (0, 0)),
                pl.BlockSpec((C_out, 1), lambda b: (0, 0)),
            ],
            out_specs=pl.BlockSpec((1, C_out, HW), lambda b: (b, 0, 0)),
        ),
        compiler_params=pltpu.CompilerParams(
            dimension_semantics=("parallel",)),
    )(x, w_scaled, bias)

    # Already NCHW; just unflatten spatial.
    return y.reshape(B, C_out, H, W)


def _reference(x_nchw, conv_w, bn_gamma, bn_beta, bn_mean, bn_var,
               *, relu=True, center_size=7, eps=1e-5):
    # plain-JAX reference matching the PyTorch module exactly (crop AFTER conv)
    B, C_in, H, W = x_nchw.shape
    C_out = conv_w.shape[0]
    w = conv_w.reshape(C_out, C_in)
    y = jnp.einsum("bchw,oc->bohw", x_nchw, w)
    scale = (bn_gamma / jnp.sqrt(bn_var + eps)).reshape(1, C_out, 1, 1)
    bias = (bn_beta - bn_mean * bn_gamma / jnp.sqrt(bn_var + eps)).reshape(1, C_out, 1, 1)
    y = y * scale + bias
    if relu:
        y = jnp.maximum(y, 0.0)
    if W < 20:
        l = (W - center_size) // 2
        r = l + center_size
        y = y[:, :, l:r, l:r]
    return y


if __name__ == "__main__":
    # Small shapes consistent with the module: B=2, C_in=4, C_out=8, H=W=16.
    B, C_in, C_out, H, W = 2, 4, 8, 16, 16
    key = jax.random.PRNGKey(0)
    kx, kw, kg, kb = jax.random.split(key, 4)

    x = jax.random.normal(kx, (B, C_in, H, W), dtype=jnp.float32)

    # Deterministic synthetic parameters (Conv2d weight, BN gamma/beta/running stats).
    conv_w = jax.random.normal(kw, (C_out, C_in, 1, 1), dtype=jnp.float32) * 0.1
    bn_gamma = 1.0 + 0.1 * jax.random.normal(kg, (C_out,), dtype=jnp.float32)
    bn_beta = 0.1 * jax.random.normal(kb, (C_out,), dtype=jnp.float32)
    bn_mean = jnp.zeros((C_out,), dtype=jnp.float32)   # nn.BatchNorm2d default running_mean
    bn_var = jnp.ones((C_out,), dtype=jnp.float32)     # nn.BatchNorm2d default running_var

    out = man_neck_forward(x, conv_w, bn_gamma, bn_beta, bn_mean, bn_var,
                           relu=True, center_size=7)
    out = jax.block_until_ready(out)

    ref = _reference(x, conv_w, bn_gamma, bn_beta, bn_mean, bn_var,
                     relu=True, center_size=7)
    assert out.shape == (B, C_out, 7, 7), out.shape
    assert jnp.allclose(out, ref, atol=1e-5, rtol=1e-5), float(jnp.abs(out - ref).max())

    print("KERNEL_OK")
</pallas_src>

<mosaic_0001>
module attributes {stable_mosaic.version = 11 : i64} {
  func.func @_neck_kernel(%arg0: i32, %arg1: memref<1x4x49xf32, #tpu.memory_space<vmem>>, %arg2: memref<8x4xf32, #tpu.memory_space<vmem>>, %arg3: memref<8x1xf32, #tpu.memory_space<vmem>>, %arg4: memref<1x8x49xf32, #tpu.memory_space<vmem>>) attributes {dimension_semantics = [#tpu.dimension_semantics<parallel>], iteration_bounds = array<i64: 2>, scalar_prefetch = 0 : i64, scratch_operands = 0 : i64, tpu.core_type = #tpu.core_type<tc>, window_params = [{transform_indices = @transform_0, window_bounds = array<i64: 1, 4, 49>}, {pipeline_mode = #tpu.pipeline_mode<synchronous>, transform_indices = @transform_1, window_bounds = array<i64: 8, 4>}, {pipeline_mode = #tpu.pipeline_mode<synchronous>, transform_indices = @transform_2, window_bounds = array<i64: 8, 1>}, {transform_indices = @transform_3, window_bounds = array<i64: 1, 8, 49>}]} {
    %c0 = arith.constant 0 : index
    %c0_0 = arith.constant 0 : index
    %0 = vector.load %arg2[%c0, %c0_0] : memref<8x4xf32, #tpu.memory_space<vmem>>, vector<8x4xf32>
    %c0_1 = arith.constant 0 : index
    %c0_2 = arith.constant 0 : index
    %c0_3 = arith.constant 0 : index
    %1 = vector.load %arg1[%c0_1, %c0_2, %c0_3] : memref<1x4x49xf32, #tpu.memory_space<vmem>>, vector<1x4x49xf32>
    %2 = vector.shape_cast %1 : vector<1x4x49xf32> to vector<4x49xf32>
    %cst = arith.constant dense<0.000000e+00> : vector<8x49xf32>
    %3 = tpu.matmul %0, %2, %cst {dimension_numbers = #tpu.dot_dimension_numbers<[1], [0], [0], [1], [0, 0, 1, 1], [], []>} : vector<8x4xf32>, vector<4x49xf32>, vector<8x49xf32> -> vector<8x49xf32>
    %c0_4 = arith.constant 0 : index
    %c0_5 = arith.constant 0 : index
    %4 = vector.load %arg3[%c0_4, %c0_5] : memref<8x1xf32, #tpu.memory_space<vmem>>, vector<8x1xf32>
    %5 = vector.broadcast %4 : vector<8x1xf32> to vector<8x49xf32>
    %6 = arith.addf %3, %5 : vector<8x49xf32>
    %cst_6 = arith.constant 0.000000e+00 : f32
    %7 = vector.broadcast %cst_6 : f32 to vector<8x49xf32>
    %8 = arith.maximumf %6, %7 : vector<8x49xf32>
    %c0_7 = arith.constant 0 : index
    %c0_8 = arith.constant 0 : index
    %c0_9 = arith.constant 0 : index
    %9 = vector.load %arg4[%c0_7, %c0_8, %c0_9] : memref<1x8x49xf32, #tpu.memory_space<vmem>>, vector<1x8x49xf32>
    %10 = vector.shape_cast %9 : vector<1x8x49xf32> to vector<8x49xf32>
    %11 = vector.shape_cast %8 : vector<8x49xf32> to vector<1x8x49xf32>
    tpu.vector_store %arg4[%c0_7, %c0_8, %c0_9], %11 {strides = array<i32>} : memref<1x8x49xf32, #tpu.memory_space<vmem>>, vector<1x8x49xf32>,
    return
  }
  func.func @transform_0(%arg0: i32) -> (i32, i32, i32) {
    %c0_i32 = arith.constant 0 : i32
    %c0_i32_0 = arith.constant 0 : i32
    %c0_i32_1 = arith.constant 0 : i32
    return %arg0, %c0_i32, %c0_i32_0 : i32, i32, i32
  }
  func.func @transform_1(%arg0: i32) -> (i32, i32) {
    %c0_i32 = arith.constant 0 : i32
    %c0_i32_0 = arith.constant 0 : i32
    %c0_i32_1 = arith.constant 0 : i32
    return %c0_i32, %c0_i32_0 : i32, i32
  }
  func.func @transform_2(%arg0: i32) -> (i32, i32) {
    %c0_i32 = arith.constant 0 : i32
    %c0_i32_0 = arith.constant 0 : i32
    %c0_i32_1 = arith.constant 0 : i32
    return %c0_i32, %c0_i32_0 : i32, i32
  }
  func.func @transform_3(%arg0: i32) -> (i32, i32, i32) {
    %c0_i32 = arith.constant 0 : i32
    %c0_i32_0 = arith.constant 0 : i32
    %c0_i32_1 = arith.constant 0 : i32
    return %arg0, %c0_i32, %c0_i32_0 : i32, i32, i32
  }
}

</mosaic_0001>

<bundles_post_ra>
// kernel: tpu_custom_call.1
= control target key start
LH: loop header
LB: loop body
LE: loop exit
PB: predicated region body
PF: predicated region fallthrough
CT: control target
= control target key end

     0   :  { %8 = vsyncpa [#allocation3], 0  ;;  %s509_s0 = inlined_call_operand.vmem [shape: f32[2,4,49], index: 0, kind: input, shape index: {}]   ;;  %s510_s1 = inlined_call_operand.vmem [shape: f32[8,4], index: 1, kind: input, shape index: {}]   ;;  %s511_s2 = inlined_call_operand.vmem [shape: f32[8,1], index: 2, kind: input, shape index: {}]   ;;  %s512_s3 = inlined_call_operand.hbm [shape: f32[2,8,49], index: 3, kind: output, shape index: {}]  }
   0x1   :  { %10 = vsyncpa [#allocation3 + $0x1], 0  ;;  %s418_s12 = smov 0   ;;  %s420_s13 = smov 0  }
   0x2   :  { %s422_s14 = smov 0   ;;  %s424_s15 = smov 0  }
   0x3 LB: > { %s439_s16 = sadd.s32 4294967295, %s395_s15   ;;  %s280_s17 = sadd.s32 4294967294, %s395_s15   ;;  %s395_s15 = sphi %s424_s15, %s518_s15   ;;  %s391_s14 = sphi %s422_s14, %s517_s14   ;;  %s387_s13 = sphi %s420_s13, %s516_s13   ;;  %s383_s12 = sphi %s418_s12, %s515_s12  }
   0x4   : > { %s443_s18 = sadd.s32 1, %s395_s15   ;;  %s91_s19 = sadd.s32 1, %s391_s14 }
   0x5   : > { %s88_s20 = ssub.s32 %s395_s15, %s443_s18  ;;  %p101_p0 = scmp.ne.s32.totalorder %s391_s14, %s387_s13 }
   0x6   : > { %p89_p1 = scmp.eq.s32.totalorder %s88_s20, 0  ;;  %p102_p2 = scmp.eq.s32.totalorder %s439_s16, 1 }
   0x7   : > { %p107_p3 = scmp.ne.s32.totalorder %s387_s13, %s383_s12  ;;  %p108_p4 = scmp.eq.s32.totalorder %s280_s17, 1 }
   0x8   : > { %s454_s21 = scalar_select %p89_p1, %s391_s14, %s91_s19  }
   0x9   : > { %p456_p5 = por %p102_p2, %p101_p0  ;;  %p460_p6 = por %p108_p4, %p107_p3 }
   0xa   : > { %p283_p7 = scmp.ge.s32.totalorder %s395_s15, 1  ;;  %p139_p8 = scmp.lt.s32.totalorder %s395_s15, 3 }
   0xc   : > { %p140_p9 = pnand %p283_p7, %p139_p8 }
   0xd   : > { %p162_p10 = scmp.lt.s32.totalorder (!%p140_p9), %s439_s16, 1  ;;  %s159_s6 = sand.u32 (!%p140_p9), 1, %s387_s13  }
   0xe   : > { %143 = sbr.rel (%p140_p9) target bundleno = 158 (0x9e), region = 32  ;;  %s284_s7 = sshll.u32 (!%p140_p9), %s159_s6, 3 }
   0xf   : > { %s289_s8 = sshll.u32 (!%p140_p9), %s439_s16, 3  ;;  %s161_s17 = scalar_lea.vmem (!%p140_p9), [#allocation2], %s284_s7 }
  0x10   : > { %s216_s11 = scalar_lea.hbm (!%p140_p9), %s512_s3, %s289_s8  ;;  %s218_s19 = sshll.u32 (!%p140_p9), %s161_s17, 4  ;;  %s219_s19 = int_to_ptr.vmem [resolvable:$true] %s218_s19 }
  0x11   : > { %s220_s20 = sshll.u32 (!%p140_p9), %s216_s11, 4  ;;  %s206_s24 = scalar_lea.sflag (!%p140_p9), [#allocation3], %s159_s6  ;;  %s221_s20 = int_to_ptr.hbm [resolvable:$true] %s220_s20 }
  0x12   : > { %s347_s25 = sshra.s32 (!%p140_p9), %s221_s20, 4  ;;  %s353_s28 = scalar_lea.hbm (!%p140_p9), %s512_s3, 16  ;;  %s348_s25 = int_to_ptr.hbm [resolvable:$true] %s347_s25 }
  0x13   : > { %v168_v0 = vld [vmem:[%s511_s2] sm:$0xff]  ;;  %v397_v1 = vmov 0   ;;  %s163_s26 = scalar_select %p162_p10, %s439_s16, 1  ;;  %vm178_vm0 = vcmask 1043456   ;;  %vm174_vm1 = vcmask 31744   ;;  %vm203_vm2 = vcmask 400384  }
  0x14   : > { %332 = vset.pattern.permute.xlu0 %v397_v1  ;;  %v166_v2 = vld [vmem:[%s510_s1] sm:$0xff]  ;;  %s349_s16 = scalar_lea.hbm %s348_s25, 8  ;;  %p354_p0 = scmp.lt.s32.totalorder %s348_s25, %s512_s3 }
  0x15   : > { %171 = vperm.xlu0 %332, %v168_v0   ;;  %s285_s27 = sshll.u32 %s163_s26, 2  ;;  %p350_p11 = scmp.ne.s32.totalorder %s348_s25, %s349_s16 }
  0x16   : > { %s165_s30 = scalar_lea.vmem %s509_s0, %s285_s27  ;;  %p355_p1 = scmp.lt.s32.totalorder %s353_s28, %s349_s16 }
  0x17   : > { %v167_v3 = vld [vmem:[%s165_s30] sm:$0xf]  ;;  %p351_p12 = pnand %p350_p11, %p456_p5 }
  0x18   : > { %286 = vmatpush.msk.msra.mxu0 %vm178_vm0, %v167_v3  ;;  %p356_p2 = por %p355_p1, %p354_p0 }
  0x19   : > { %287 = vmatmul.msk.f32.vlgmr.msra.gmra.mxu0 %vm174_vm1, %v166_v2  ;;  %p352_p13 = pneg %p351_p12 }
  0x1b   : > { %p357_p3 = pnand %p356_p2, %p352_p13 }
  0x87   : > { %v172_v4 = vpop.permute.xlu0 %171 }
  0x96   : > { %v199_v5 = vpop.f32.mrf.mxu0 }
  0x97   : > { %v200_v6 = vadd.f32 %v199_v5, %v172_v4 }
  0x99   : > { %v202_v7 = vmax.f32 %v200_v6, 0.0 }
  0x9b   : > { %204 = vst.msk [vmem:[%s161_s17] sm:$0xff] %vm203_vm2, %v202_v7 }
  0x9c   : > { %360 = shalt.err (!%p357_p3)
}
  0x9d   : > { %292 = dma.vmem_to_hbm [thread:$0]  (%p456_p5), %s219_s19, 128, %s221_s20, %s206_s24  }
  0x9e PF: > { %p298_p4 = scmp.ge.s32.totalorder %s395_s15, 2  ;;  %s232_s4 = sand.u32 1, %s383_s12  }
  0x9f   : > { %s233_s5 = scalar_lea.sflag [#allocation3], %s232_s4 }
  0xa0   : > { %p295_p7 = pnand %p298_p4, %p460_p6 }
  0xa2   : > { %p296_p8 = pneg %p295_p7 }
  0xa4   : > { %378 = dma.done.wait (%p296_p8), %s233_s5, 128  }
  0xa5   : > { %380 = vsyncadd (%p296_p8), %s233_s5, 4294967168  ;;  %p13_p9 = scmp.ge.s32.totalorder %s443_s18, 4   ;;  %s515_s12 = smov %s387_s13 }
  0xa6   : > { %s516_s13 = smov %s391_s14  ;;  %s517_s14 = smov %s454_s21 }
  0xa7   : > { %s518_s15 = smov %s443_s18  ;;  %15 = sbr.rel (!%p13_p9) target bundleno = 3 (0x3), region = 67 }
  0xac   :  { %239 = vsyncpa [#allocation3], 1 }
  0xad   :  { %241 = vsyncpa [#allocation3 + $0x1], 1 }

</bundles_post_ra>
